<compile_context>
chip_gen: v7x
topology: tpu7x:2x2x1
jax: 0.10.0
libtpu: 0.0.40
codegen_flags: <defaults>
</compile_context>

<pallas_src>
import functools

import jax
import jax.numpy as jnp
from jax.experimental import pallas as pl
from jax.experimental.pallas import tpu as pltpu

_LANE = 128
_VMEM_LIMIT = 48 * 1024 * 1024  # below v7x's 64 MiB physical VMEM, generous on v5e/v6e


def _round_up(x, m):
    return (x + m - 1) // m * m


def _is_v5():
    try:
        return "v5" in jax.devices()[0].device_kind.lower()
    except Exception:
        return False


_V5 = _is_v5()


def _pick_tm(m, cap=512):
    if m % 8 != 0:
        return m  # full-dim block (exempt from the (8,128) divisibility rule)
    tm = min(m, cap)
    tm -= tm % 8
    while m % tm:
        tm -= 8
    return tm


def _pick_tn(n_pad):
    # n_pad is always a multiple of 128.  v5e MXU is 128-wide; v6e/v7x are 256-wide.
    if (not _V5) and n_pad % 256 == 0:
        return 256
    return 128


def _pick_tk(k):
    # Bound per-buffer VMEM with a K tile; fall back to the full K when it doesn't divide.
    return 512 if k % 512 == 0 else k


# ----------------------------------------------------------------------------
# Pallas kernels
# ----------------------------------------------------------------------------
def _matmul_bn_kernel(a_ref, w_ref, scale_ref, shift_ref, o_ref, acc_ref, *, relu):
    k = pl.program_id(2)

    @pl.when(k == 0)
    def _():
        acc_ref[...] = jnp.zeros_like(acc_ref)

    acc_ref[...] += jnp.dot(a_ref[...], w_ref[...], preferred_element_type=jnp.float32)

    @pl.when(k == pl.num_programs(2) - 1)
    def _():
        y = acc_ref[...] * scale_ref[...] + shift_ref[...]
        if relu:
            y = jnp.maximum(y, 0.0)
        o_ref[...] = y.astype(o_ref.dtype)


def _matmul_bn_res_kernel(a_ref, w_ref, scale_ref, shift_ref, res_ref, o_ref, acc_ref, *, relu):
    k = pl.program_id(2)

    @pl.when(k == 0)
    def _():
        acc_ref[...] = jnp.zeros_like(acc_ref)

    acc_ref[...] += jnp.dot(a_ref[...], w_ref[...], preferred_element_type=jnp.float32)

    @pl.when(k == pl.num_programs(2) - 1)
    def _():
        y = acc_ref[...] * scale_ref[...] + shift_ref[...] + res_ref[...].astype(jnp.float32)
        if relu:
            y = jnp.maximum(y, 0.0)
        o_ref[...] = y.astype(o_ref.dtype)


def _conv_taps_kernel(x_ref, w_ref, scale_ref, shift_ref, o_ref, acc_ref, *, taps, l_out, relu):
    # x_ref: (1, P, L, Cin)   w_ref: (T, Cin, tn)   scale/shift: (1, tn)
    # o_ref: (1, l_out, tn)   acc_ref: (l_out, tn) f32
    acc_ref[...] = jnp.zeros_like(acc_ref)
    for p in range(x_ref.shape[1]):
        xv = x_ref[0, p]  # aligned full load of one phase: (L, Cin)
        for t, (tp, s) in enumerate(taps):
            if tp != p:
                continue
            acc_ref[...] += jnp.dot(xv[s:s + l_out, :], w_ref[t],
                                    preferred_element_type=jnp.float32)
    y = acc_ref[...] * scale_ref[...] + shift_ref[...]
    if relu:
        y = jnp.maximum(y, 0.0)
    o_ref[0] = y.astype(o_ref.dtype)


def _pool_taps_kernel(x_ref, o_ref, *, taps, l_out):
    # x_ref: (1, P, L, C)  ->  o_ref: (1, l_out, C), max over the 9 shifted taps.
    m = None
    for p in range(x_ref.shape[1]):
        xv = x_ref[0, p]
        for tp, s in taps:
            if tp != p:
                continue
            v = xv[s:s + l_out, :]
            m = v if m is None else jnp.maximum(m, v)
    o_ref[0] = m


# ----------------------------------------------------------------------------
# Pallas wrappers
# ----------------------------------------------------------------------------
def matmul_bn(a, w_mat, scale, shift, *, relu, residual=None, out_dtype=jnp.bfloat16):
    """(M,K) @ (K,N) with folded-BN scale/shift, optional residual and ReLU fused.

    MXU is fed bf16, accumulation + epilogue are f32, output N is padded to a multiple
    of 128 (lane-dense stores).  Returns the (M, N_pad) array; pad columns are zero.
    """
    M, K = a.shape
    Kw, N = w_mat.shape
    assert K == Kw
    n_pad = _round_up(N, _LANE)
    if n_pad != N:
        w_mat = jnp.pad(w_mat, ((0, 0), (0, n_pad - N)))
        scale = jnp.pad(scale, (0, n_pad - N), constant_values=1.0)
        shift = jnp.pad(shift, (0, n_pad - N))
        if residual is not None:
            residual = jnp.pad(residual, ((0, 0), (0, n_pad - N)))

    tm, tn, tk = _pick_tm(M), _pick_tn(n_pad), _pick_tk(K)
    assert M % tm == 0 and n_pad % tn == 0 and K % tk == 0
    grid = (M // tm, n_pad // tn, K // tk)

    a = a.astype(jnp.bfloat16)
    w_mat = w_mat.astype(jnp.bfloat16)
    scale2 = scale.reshape(1, n_pad).astype(jnp.float32)
    shift2 = shift.reshape(1, n_pad).astype(jnp.float32)

    in_specs = [
        pl.BlockSpec((tm, tk), lambda i, j, k: (i, k)),
        pl.BlockSpec((tk, tn), lambda i, j, k: (k, j)),
        pl.BlockSpec((1, tn), lambda i, j, k: (0, j)),
        pl.BlockSpec((1, tn), lambda i, j, k: (0, j)),
    ]
    args = [a, w_mat, scale2, shift2]
    if residual is not None:
        in_specs.append(pl.BlockSpec((tm, tn), lambda i, j, k: (i, j)))
        args.append(residual.astype(jnp.bfloat16))
        kernel = functools.partial(_matmul_bn_res_kernel, relu=relu)
    else:
        kernel = functools.partial(_matmul_bn_kernel, relu=relu)

    return pl.pallas_call(
        kernel,
        out_shape=jax.ShapeDtypeStruct((M, n_pad), out_dtype),
        grid=grid,
        in_specs=in_specs,
        out_specs=pl.BlockSpec((tm, tn), lambda i, j, k: (i, j)),
        scratch_shapes=[pltpu.VMEM((tm, tn), jnp.float32)],
        compiler_params=pltpu.CompilerParams(
            dimension_semantics=("parallel", "parallel", "arbitrary"),
            vmem_limit_bytes=_VMEM_LIMIT,
        ),
    )(*args)


def _phase_flatten(xp, *, stride, kh, kw, ho, pad_value):
    """Flatten a spatially padded NHWC tensor into stride**2 'phase' sequences so every
    conv/pool tap (dy, dx) becomes a constant row shift of one phase."""
    B, Hp, Wp, C = xp.shape
    if stride == 1:
        phases = xp[:, None]
        w_eff = Wp
    else:
        hp_e, wp_e = _round_up(Hp, stride), _round_up(Wp, stride)
        if (hp_e, wp_e) != (Hp, Wp):
            xp = jnp.pad(xp, ((0, 0), (0, hp_e - Hp), (0, wp_e - Wp), (0, 0)),
                         constant_values=pad_value)
        phases = jnp.stack([xp[:, py::stride, px::stride, :]
                            for py in range(stride) for px in range(stride)], axis=1)
        w_eff = wp_e // stride
    flat = phases.reshape(B, phases.shape[1], -1, C)
    taps = tuple(((dy % stride) * stride + (dx % stride),
                  (dy // stride) * w_eff + (dx // stride))
                 for dy in range(kh) for dx in range(kw))
    l_out = ho * w_eff
    need = l_out + max(s for _, s in taps)
    if flat.shape[2] < need:
        flat = jnp.pad(flat, ((0, 0), (0, 0), (0, need - flat.shape[2]), (0, 0)),
                       constant_values=pad_value)
    return flat, taps, l_out, w_eff


def conv_kxk_direct(x, w, scale, shift, *, stride, padding, relu):
    """Direct KxK conv: no HBM im2col.  The padded activation is read once per image;
    each of the kh*kw taps is a static row-shifted slice of the flattened VMEM block
    feeding one MXU matmul, accumulated in an f32 scratch with the BN/ReLU epilogue."""
    B, H, W, Cp = x.shape
    Cout, Cin, kh, kw = w.shape
    if Cp > Cin:  # activation carries zero pad channels
        w = jnp.pad(w, ((0, 0), (0, Cp - Cin), (0, 0), (0, 0)))
        Cin = Cp
    Ho = (H + 2 * padding - kh) // stride + 1
    Wo = (W + 2 * padding - kw) // stride + 1

    x = x.astype(jnp.bfloat16)
    xp = jnp.pad(x, ((0, 0), (padding, padding), (padding, padding), (0, 0)))
    flat, taps, l_out, w_eff = _phase_flatten(xp, stride=stride, kh=kh, kw=kw,
                                              ho=Ho, pad_value=0.0)

    n_pad = _round_up(Cout, _LANE)
    w_mat = jnp.transpose(w, (2, 3, 1, 0)).reshape(kh * kw, Cin, Cout)
    if n_pad != Cout:
        w_mat = jnp.pad(w_mat, ((0, 0), (0, 0), (0, n_pad - Cout)))
        scale = jnp.pad(scale, (0, n_pad - Cout), constant_values=1.0)
        shift = jnp.pad(shift, (0, n_pad - Cout))
    tn = _pick_tn(n_pad)

    w_mat = w_mat.astype(jnp.bfloat16)
    scale2 = scale.reshape(1, n_pad).astype(jnp.float32)
    shift2 = shift.reshape(1, n_pad).astype(jnp.float32)
    P, L = flat.shape[1], flat.shape[2]
    T = kh * kw

    out = pl.pallas_call(
        functools.partial(_conv_taps_kernel, taps=taps, l_out=l_out, relu=relu),
        out_shape=jax.ShapeDtypeStruct((B, l_out, n_pad), jnp.bfloat16),
        grid=(B, n_pad // tn),
        in_specs=[
            pl.BlockSpec((1, P, L, Cin), lambda b, j: (b, 0, 0, 0)),
            pl.BlockSpec((T, Cin, tn), lambda b, j: (0, 0, j)),
            pl.BlockSpec((1, tn), lambda b, j: (0, j)),
            pl.BlockSpec((1, tn), lambda b, j: (0, j)),
        ],
        out_specs=pl.BlockSpec((1, l_out, tn), lambda b, j: (b, 0, j)),
        scratch_shapes=[pltpu.VMEM((l_out, tn), jnp.float32)],
        compiler_params=pltpu.CompilerParams(
            dimension_semantics=("parallel", "parallel"),
            vmem_limit_bytes=_VMEM_LIMIT,
        ),
    )(flat, w_mat, scale2, shift2)

    return out.reshape(B, Ho, w_eff, n_pad)[:, :, :Wo, :]


def maxpool_3x3_s2(x):
    """MaxPool2d(3, stride=2, padding=1): padded input read once per image, 9 taps
    reduced with jnp.maximum in-kernel, lane-dense output (C already padded to 128)."""
    x = x.astype(jnp.bfloat16)
    B, H, W, C = x.shape
    Ho = (H - 1) // 2 + 1
    Wo = (W - 1) // 2 + 1
    xp = jnp.pad(x, ((0, 0), (1, 1), (1, 1), (0, 0)), constant_values=-jnp.inf)
    flat, taps, l_out, w_eff = _phase_flatten(xp, stride=2, kh=3, kw=3, ho=Ho,
                                              pad_value=-jnp.inf)
    P, L = flat.shape[1], flat.shape[2]
    out = pl.pallas_call(
        functools.partial(_pool_taps_kernel, taps=taps, l_out=l_out),
        out_shape=jax.ShapeDtypeStruct((B, l_out, C), jnp.bfloat16),
        grid=(B,),
        in_specs=[pl.BlockSpec((1, P, L, C), lambda b: (b, 0, 0, 0))],
        out_specs=pl.BlockSpec((1, l_out, C), lambda b: (b, 0, 0)),
        compiler_params=pltpu.CompilerParams(
            dimension_semantics=("parallel",),
            vmem_limit_bytes=_VMEM_LIMIT,
        ),
    )(flat)
    return out.reshape(B, Ho, w_eff, C)[:, :, :Wo, :]


# ----------------------------------------------------------------------------
# Conv + BN (+residual, +ReLU) dispatch
# ----------------------------------------------------------------------------
def _bn_fold(bn, eps=1e-5):
    scale = bn["gamma"] / jnp.sqrt(bn["var"] + eps)
    shift = bn["beta"] - bn["mean"] * scale
    return scale, shift


def _extract_patches(x, kh, kw, stride, padding):
    # Only used for the 7x7 / Cin=3 stem: im2col keeps the MXU contraction at K=147.
    B, H, W, C = x.shape
    xp = jnp.pad(x, ((0, 0), (padding, padding), (padding, padding), (0, 0)))
    Ho = (H + 2 * padding - kh) // stride + 1
    Wo = (W + 2 * padding - kw) // stride + 1
    views = []
    for i in range(kh):
        for j in range(kw):
            views.append(xp[:, i:i + stride * (Ho - 1) + 1:stride,
                            j:j + stride * (Wo - 1) + 1:stride, :])
    p = jnp.stack(views, axis=3)  # (B, Ho, Wo, kh*kw, C)
    return p.reshape(B * Ho * Wo, kh * kw * C), (B, Ho, Wo)


def conv_bn_act(x, w, bn, *, stride=1, padding=0, relu=True, residual=None):
    """x: NHWC bf16 activation whose physical channel count may exceed w's Cin (extras are
    exact zeros); w: PyTorch layout (Cout, Cin, kh, kw).  BN is inference-folded."""
    C_out, C_in, kh, kw = w.shape
    scale, shift = _bn_fold(bn)
    Cp = x.shape[-1]
    if Cp > C_in:
        w = jnp.pad(w, ((0, 0), (0, Cp - C_in), (0, 0), (0, 0)))
        C_in = Cp

    if kh == 1 and kw == 1:
        if stride > 1:
            x = x[:, ::stride, ::stride, :]
        B, Ho, Wo, _ = x.shape
        a = x.reshape(B * Ho * Wo, C_in)
        w_mat = w.reshape(C_out, C_in).T
        res2 = residual.reshape(B * Ho * Wo, -1) if residual is not None else None
        out = matmul_bn(a, w_mat, scale, shift, relu=relu, residual=res2)
        return out.reshape(B, Ho, Wo, out.shape[-1])

    if kh == 3 and kw == 3 and residual is None:
        return conv_kxk_direct(x, w, scale, shift, stride=stride, padding=padding, relu=relu)

    # TODO(synk): the 7x7/Cin=3 stem still uses an HBM im2col (K=147); a direct-tap version
    # would read the tiny 3-channel input once but starve the MXU with K=3.
    patches, (B, Ho, Wo) = _extract_patches(x.astype(jnp.bfloat16), kh, kw, stride, padding)
    w_mat = jnp.transpose(w, (2, 3, 1, 0)).reshape(kh * kw * C_in, C_out)
    res2 = residual.reshape(B * Ho * Wo, -1) if residual is not None else None
    out = matmul_bn(patches, w_mat, scale, shift, relu=relu, residual=res2)
    return out.reshape(B, Ho, Wo, out.shape[-1])


# ----------------------------------------------------------------------------
# Deterministic synthetic parameters (ResNet50 shapes, two-stream BN)
# ----------------------------------------------------------------------------
def _init_conv(key, c_out, c_in, kh, kw):
    fan_in = c_in * kh * kw
    std = (2.0 / fan_in) ** 0.5
    return std * jax.random.normal(key, (c_out, c_in, kh, kw), jnp.float32)


def _init_bn(key, c):
    k1, k2, k3, k4 = jax.random.split(key, 4)
    return dict(
        gamma=1.0 + 0.1 * jax.random.normal(k1, (c,), jnp.float32),
        beta=0.1 * jax.random.normal(k2, (c,), jnp.float32),
        mean=0.1 * jax.random.normal(k3, (c,), jnp.float32),
        var=1.0 + 0.1 * jax.random.uniform(k4, (c,), jnp.float32),
    )


def _init_bn2(key, c):
    km, ks = jax.random.split(key)
    return {"m": _init_bn(km, c), "s": _init_bn(ks, c)}  # modal 0 / modal 3 (shape) BN sets


def _init_bottleneck(key, in_c, planes, stride, downsample):
    keys = jax.random.split(key, 8)
    p = dict(
        conv1=_init_conv(keys[0], planes, in_c, 1, 1),
        bn1=_init_bn2(keys[1], planes),
        conv2=_init_conv(keys[2], planes, planes, 3, 3),
        bn2=_init_bn2(keys[3], planes),
        conv3=_init_conv(keys[4], planes * 4, planes, 1, 1),
        bn3=_init_bn2(keys[5], planes * 4),
        stride=stride,
    )
    if downsample:
        p["down_conv"] = _init_conv(keys[6], planes * 4, in_c, 1, 1)
        p["down_bn"] = _init_bn2(keys[7], planes * 4)
    return p


def _make_layer(key, in_c, planes, blocks, stride):
    keys = jax.random.split(key, blocks)
    layer = [_init_bottleneck(keys[0], in_c, planes, stride,
                              downsample=(stride != 1 or in_c != planes * 4))]
    for i in range(1, blocks):
        layer.append(_init_bottleneck(keys[i], planes * 4, planes, 1, False))
    return layer


def _init_resnet50(key):
    ks = jax.random.split(key, 6)
    return dict(
        conv1=_init_conv(ks[0], 64, 3, 7, 7),
        bn1=_init_bn2(ks[1], 64),
        layer1=_make_layer(ks[2], 64, 64, 3, 1),
        layer2=_make_layer(ks[3], 256, 128, 4, 2),
        layer3=_make_layer(ks[4], 512, 256, 6, 2),
        layer4=_make_layer(ks[5], 1024, 512, 3, 1),  # last_conv_stride=1, dilation=1
    )


def init_embed_net(key, class_num=256):
    kv, kt, kb, kbi, kc = jax.random.split(key, 5)
    return dict(
        visible=_init_resnet50(kv),
        thermal=_init_resnet50(kt),
        bottleneck=_init_bn(kb, 2048),
        bottleneck_ir=_init_bn(kbi, 2048),
        classifier_w=0.001 * jax.random.normal(kc, (class_num, 2048), jnp.float32),
    )


# ----------------------------------------------------------------------------
# Forward (mirrors embed_net_twostream.forward, mode=0, x*_shape=None)
# ----------------------------------------------------------------------------
def _bottleneck_forward(x, p, mk):
    out = conv_bn_act(x, p["conv1"], p["bn1"][mk], stride=1, padding=0, relu=True)
    out = conv_bn_act(out, p["conv2"], p["bn2"][mk], stride=p["stride"], padding=1, relu=True)
    if "down_conv" in p:
        identity = conv_bn_act(x, p["down_conv"], p["down_bn"][mk],
                               stride=p["stride"], padding=0, relu=False)
    else:
        identity = x
    # bn3(conv3(out)) + identity, then ReLU  -- fused in the matmul epilogue
    return conv_bn_act(out, p["conv3"], p["bn3"][mk], stride=1, padding=0,
                       relu=True, residual=identity)


def resnet_backbone(x_nchw, params, modal=0):
    """visible_module_twostream / thermal_module_twostream forward (returns NHWC bf16).
    modal == 0 selects bn*, modal == 3 selects bn*_shape."""
    mk = "m" if modal == 0 else "s"
    x = jnp.transpose(x_nchw, (0, 2, 3, 1)).astype(jnp.bfloat16)  # NCHW -> NHWC
    x = conv_bn_act(x, params["conv1"], params["bn1"][mk], stride=2, padding=3, relu=True)
    x = maxpool_3x3_s2(x)
    for layer_name in ("layer1", "layer2", "layer3", "layer4"):
        for blk in params[layer_name]:
            x = _bottleneck_forward(x, blk, mk)
    return x


def embed_net_twostream_forward(x1, x2, params):
    """embed_net_twostream.forward with mode=0, x1_shape=x2_shape=None:
    returns (x_pool, classifier(feat)) exactly like the PyTorch module."""
    f1 = resnet_backbone(x1, params["visible"], modal=0)
    f2 = resnet_backbone(x2, params["thermal"], modal=0)
    x = jnp.concatenate([f1, f2], axis=0)  # (2B, h, w, 2048), NHWC

    # GM pool (p=3) over spatial; tiny reduction, plain-JAX glue around the Pallas backbone.
    xf = x.astype(jnp.float32).reshape(x.shape[0], -1, x.shape[-1])
    x_pool = (jnp.mean(xf ** 3.0, axis=1) + 1e-12) ** (1.0 / 3.0)  # (2B, 2048)

    # BN-neck (inference-folded affine, separate BN per modality half) + classifier matmul.
    b1 = x1.shape[0]
    sc_v, sh_v = _bn_fold(params["bottleneck"])
    sc_i, sh_i = _bn_fold(params["bottleneck_ir"])
    feat = jnp.concatenate([x_pool[:b1] * sc_v + sh_v,
                            x_pool[b1:] * sc_i + sh_i], axis=0)
    n_cls = params["classifier_w"].shape[0]
    logits = matmul_bn(feat, params["classifier_w"].T,
                       jnp.ones((n_cls,), jnp.float32), jnp.zeros((n_cls,), jnp.float32),
                       relu=False, out_dtype=jnp.float32)[:, :n_cls]
    # TODO(synk): the x*_shape training branch (modal=3 backbone pass, bottleneck_shape,
    # projection heads) is supported via resnet_backbone(modal=3) but not exercised here.
    return x_pool, logits


# ----------------------------------------------------------------------------
if __name__ == "__main__":
    key = jax.random.PRNGKey(0)
    kp, kx1, kx2 = jax.random.split(key, 3)
    params = init_embed_net(kp, class_num=256)

    # small NCHW inputs consistent with the module's RGB / thermal front-ends
    x1 = jax.random.normal(kx1, (2, 3, 64, 64), jnp.float32)
    x2 = jax.random.normal(kx2, (2, 3, 64, 64), jnp.float32)

    x_pool, logits = embed_net_twostream_forward(x1, x2, params)
    jax.block_until_ready((x_pool, logits))

    assert x_pool.shape == (4, 2048), x_pool.shape
    assert logits.shape == (4, 256), logits.shape
    assert bool(jnp.all(jnp.isfinite(x_pool))) and bool(jnp.all(jnp.isfinite(logits)))

    print("KERNEL_OK")
</pallas_src>

<mosaic_0001>
module attributes {stable_mosaic.version = 11 : i64} {
  func.func @_matmul_bn_kernel(%arg0: i32, %arg1: i32, %arg2: i32, %arg3: memref<512x147xbf16, #tpu.memory_space<vmem>>, %arg4: memref<147x128xbf16, #tpu.memory_space<vmem>>, %arg5: memref<1x128xf32, #tpu.memory_space<vmem>>, %arg6: memref<1x128xf32, #tpu.memory_space<vmem>>, %arg7: memref<512x128xbf16, #tpu.memory_space<vmem>>, %arg8: memref<512x128xf32, #tpu.memory_space<vmem>>) attributes {dimension_semantics = [#tpu.dimension_semantics<parallel>, #tpu.dimension_semantics<parallel>, #tpu.dimension_semantics<arbitrary>], iteration_bounds = array<i64: 4, 1, 1>, scalar_prefetch = 0 : i64, scratch_operands = 1 : i64, tpu.core_type = #tpu.core_type<tc>, window_params = [{transform_indices = @transform_0, window_bounds = array<i64: 512, 147>}, {transform_indices = @transform_1, window_bounds = array<i64: 147, 128>}, {transform_indices = @transform_2, window_bounds = array<i64: 1, 128>}, {transform_indices = @transform_3, window_bounds = array<i64: 1, 128>}, {transform_indices = @transform_4, window_bounds = array<i64: 512, 128>}]} {
    %c0_i32 = arith.constant 0 : i32
    %0 = arith.cmpi eq, %arg2, %c0_i32 : i32
    %1 = arith.extui %0 : i1 to i32
    %c0_i32_0 = arith.constant 0 : i32
    %2 = arith.cmpi ne, %1, %c0_i32_0 : i32
    scf.if %2 {
      %cst_10 = arith.constant 0.000000e+00 : f32
      %12 = vector.broadcast %cst_10 : f32 to vector<512x128xf32>
      %c0_11 = arith.constant 0 : index
      %c0_12 = arith.constant 0 : index
      %13 = vector.load %arg8[%c0_11, %c0_12] : memref<512x128xf32, #tpu.memory_space<vmem>>, vector<512x128xf32>
      tpu.vector_store %arg8[%c0_11, %c0_12], %12 {strides = array<i32>} : memref<512x128xf32, #tpu.memory_space<vmem>>, vector<512x128xf32>,
    } else {
    }
    %c0 = arith.constant 0 : index
    %c0_1 = arith.constant 0 : index
    %3 = vector.load %arg8[%c0, %c0_1] : memref<512x128xf32, #tpu.memory_space<vmem>>, vector<512x128xf32>
    %c0_2 = arith.constant 0 : index
    %c0_3 = arith.constant 0 : index
    %4 = vector.load %arg3[%c0_2, %c0_3] : memref<512x147xbf16, #tpu.memory_space<vmem>>, vector<512x147xbf16>
    %c0_4 = arith.constant 0 : index
    %c0_5 = arith.constant 0 : index
    %5 = vector.load %arg4[%c0_4, %c0_5] : memref<147x128xbf16, #tpu.memory_space<vmem>>, vector<147x128xbf16>
    %cst = arith.constant dense<0.000000e+00> : vector<512x128xf32>
    %6 = tpu.matmul %4, %5, %cst {dimension_numbers = #tpu.dot_dimension_numbers<[1], [0], [0], [1], [0, 0, 1, 1], [], []>} : vector<512x147xbf16>, vector<147x128xbf16>, vector<512x128xf32> -> vector<512x128xf32>
    %7 = arith.addf %3, %6 : vector<512x128xf32>
    %c0_6 = arith.constant 0 : index
    %c0_7 = arith.constant 0 : index
    %8 = vector.load %arg8[%c0_6, %c0_7] : memref<512x128xf32, #tpu.memory_space<vmem>>, vector<512x128xf32>
    tpu.vector_store %arg8[%c0_6, %c0_7], %7 {strides = array<i32>} : memref<512x128xf32, #tpu.memory_space<vmem>>, vector<512x128xf32>,
    %c0_i32_8 = arith.constant 0 : i32
    %9 = arith.cmpi eq, %arg2, %c0_i32_8 : i32
    %10 = arith.extui %9 : i1 to i32
    %c0_i32_9 = arith.constant 0 : i32
    %11 = arith.cmpi ne, %10, %c0_i32_9 : i32
    scf.if %11 {
      %c0_10 = arith.constant 0 : index
      %c0_11 = arith.constant 0 : index
      %12 = vector.load %arg8[%c0_10, %c0_11] : memref<512x128xf32, #tpu.memory_space<vmem>>, vector<512x128xf32>
      %c0_12 = arith.constant 0 : index
      %c0_13 = arith.constant 0 : index
      %13 = vector.load %arg5[%c0_12, %c0_13] : memref<1x128xf32, #tpu.memory_space<vmem>>, vector<1x128xf32>
      %14 = vector.broadcast %13 : vector<1x128xf32> to vector<512x128xf32>
      %15 = arith.mulf %12, %14 : vector<512x128xf32>
      %c0_14 = arith.constant 0 : index
      %c0_15 = arith.constant 0 : index
      %16 = vector.load %arg6[%c0_14, %c0_15] : memref<1x128xf32, #tpu.memory_space<vmem>>, vector<1x128xf32>
      %17 = vector.broadcast %16 : vector<1x128xf32> to vector<512x128xf32>
      %18 = arith.addf %15, %17 : vector<512x128xf32>
      %cst_16 = arith.constant 0.000000e+00 : f32
      %19 = vector.broadcast %cst_16 : f32 to vector<512x128xf32>
      %20 = arith.maximumf %18, %19 : vector<512x128xf32>
      %21 = arith.truncf %20 : vector<512x128xf32> to vector<512x128xbf16>
      %c0_17 = arith.constant 0 : index
      %c0_18 = arith.constant 0 : index
      %22 = vector.load %arg7[%c0_17, %c0_18] : memref<512x128xbf16, #tpu.memory_space<vmem>>, vector<512x128xbf16>
      tpu.vector_store %arg7[%c0_17, %c0_18], %21 {strides = array<i32>} : memref<512x128xbf16, #tpu.memory_space<vmem>>, vector<512x128xbf16>,
    } else {
    }
    return
  }
  func.func @transform_0(%arg0: i32, %arg1: i32, %arg2: i32) -> (i32, i32) {
    %c0_i32 = arith.constant 0 : i32
    return %arg0, %arg2 : i32, i32
  }
  func.func @transform_1(%arg0: i32, %arg1: i32, %arg2: i32) -> (i32, i32) {
    %c0_i32 = arith.constant 0 : i32
    return %arg2, %arg1 : i32, i32
  }
  func.func @transform_2(%arg0: i32, %arg1: i32, %arg2: i32) -> (i32, i32) {
    %c0_i32 = arith.constant 0 : i32
    %c0_i32_0 = arith.constant 0 : i32
    return %c0_i32, %arg1 : i32, i32
  }
  func.func @transform_3(%arg0: i32, %arg1: i32, %arg2: i32) -> (i32, i32) {
    %c0_i32 = arith.constant 0 : i32
    %c0_i32_0 = arith.constant 0 : i32
    return %c0_i32, %arg1 : i32, i32
  }
  func.func @transform_4(%arg0: i32, %arg1: i32, %arg2: i32) -> (i32, i32) {
    %c0_i32 = arith.constant 0 : i32
    return %arg0, %arg1 : i32, i32
  }
}

</mosaic_0001>

<bundles_post_ra>
// kernel: tpu_custom_call.1
= control target key start
LH: loop header
LB: loop body
LE: loop exit
PB: predicated region body
PF: predicated region fallthrough
CT: control target
= control target key end

     0   :  { %9 = vsyncpa [#allocation4], 0  ;;  %s3273_s0 = inlined_call_operand.vmem [shape: bf16[2048,147], index: 0, kind: input, shape index: {}]   ;;  %s3274_s1 = inlined_call_operand.vmem [shape: bf16[147,128], index: 1, kind: input, shape index: {}]   ;;  %s3275_s2 = inlined_call_operand.vmem [shape: f32[1,128], index: 2, kind: input, shape index: {}]   ;;  %s3276_s3 = inlined_call_operand.vmem [shape: f32[1,128], index: 3, kind: input, shape index: {}]   ;;  %s3277_s4 = inlined_call_operand.hbm [shape: bf16[2048,128], index: 4, kind: output, shape index: {}]  }
   0x1   :  { %11 = vsyncpa [#allocation4 + $0x1], 0  ;;  %s2854_s15 = smov 0   ;;  %s2856_s16 = smov 0  }
   0x2   :  { %s2858_s17 = smov 0   ;;  %s2860_s18 = smov 0  }
   0x3   :  { %s2862_s19 = smov 0   ;;  %s2864_s20 = smov 0  }
   0x4 LB: > { %s2113_s21 = sadd.s32 4294967295, %s2822_s20   ;;  %s2114_s22 = sadd.s32 4294967294, %s2822_s20   ;;  %s2822_s20 = sphi %s2864_s20, %s17_s20   ;;  %s2818_s19 = sphi %s2862_s19, %s3284_s19   ;;  %s2814_s18 = sphi %s2860_s18, %s3283_s18   ;;  %s2810_s17 = sphi %s2858_s17, %s3282_s17   ;;  %s2806_s16 = sphi %s2856_s16, %s3281_s16   ;;  %s2802_s15 = sphi %s2854_s15, %s3280_s15  }
   0x5   : > { %s36_s23 = sadd.s32 1, %s2818_s19  ;;  %s153_s24 = sadd.s32 1, %s2810_s17 }
   0x6   : > { %p38_p0 = scmp.ge.s32.totalorder %s36_s23, 4  ;;  %p163_p1 = scmp.ne.s32.totalorder %s2810_s17, %s2806_s16 }
   0x7   : > { %p164_p2 = scmp.eq.s32.totalorder %s2113_s21, 3  ;;  %p169_p3 = scmp.ne.s32.totalorder %s2806_s16, %s2802_s15 }
   0x8   : > { %s3286_s23 = smov (%p38_p0, %s36_s23), 0  ;;  %p170_p5 = scmp.eq.s32.totalorder %s2114_s22, 3 }
   0x9   : > { %p2894_p4 = por %p164_p2, %p163_p1  ;;  %s148_s26 = ssub.s32 %s2818_s19, %s3286_s23 }
   0xa   : > { %p2120_p6 = scmp.ge.s32.totalorder %s2822_s20, 1  ;;  %p151_p7 = scmp.eq.s32.totalorder %s148_s26, 0 }
   0xb   : > { %p2901_p8 = por %p170_p5, %p169_p3  ;;  %p227_p9 = scmp.lt.s32.totalorder %s2822_s20, 5 }
   0xc   : > { %s2907_s28 = scalar_select %p151_p7, %s2810_s17, %s153_s24  }
   0xd   : > { %p228_p10 = pnand %p2120_p6, %p227_p9 }
   0xe   : > { %v2638_v0 = vld [vmem:[%s3274_s1] sm:$0xff] (!%p228_p10)   ;;  %v2824_v1 = vmov (!%p228_p10), 0   ;;  %v2639_v2 = vld [vmem:[%s3274_s1 + $0x8] sm:$0xff] (!%p228_p10)   ;;  %v2640_v3 = vld [vmem:[%s3274_s1 + $0x10] sm:$0xff] (!%p228_p10)   ;;  %s2122_s9 = sshll.u32 (!%p228_p10), %s2814_s18, 6  ;;  %vm861_vm0 = vcmask (!%p228_p10), 154624  }
   0xf   : > { %231 = sbr.rel (%p228_p10) target bundleno = 413 (0x19d), region = 36  ;;  %965 = vmatprep.subr.bf16.mxu0 (!%p228_p10), %v2824_v1  ;;  %2559 = vmatprep.subr.bf16.mxu1 (!%p228_p10), %v2824_v1  ;;  %p274_p11 = scmp.lt.s32.totalorder (!%p228_p10), %s2122_s9, 255  ;;  %v2641_v4 = vld [vmem:[%s3274_s1 + $0x18] sm:$0xff] (!%p228_p10)   ;;  %v2642_v5 = vld [vmem:[%s3274_s1 + $0x20] sm:$0xff] (!%p228_p10)   ;;  %v2643_v8 = vld [vmem:[%s3274_s1 + $0x28] sm:$0xff] (!%p228_p10)   ;;  %vm958_vm1 = vcmask (!%p228_p10), 1040384  }
  0x10   : > { %966 = vmatpush1.bf16.msra.mxu0 (!%p228_p10), %v2638_v0  ;;  %2569 = vmatpush1.bf16.msra.mxu1 (!%p228_p10), %v2638_v0  ;;  %v2644_v9 = vld [vmem:[%s3274_s1 + $0x30] sm:$0xff] (!%p228_p10)   ;;  %v2645_v10 = vld [vmem:[%s3274_s1 + $0x38] sm:$0xff] (!%p228_p10)   ;;  %vm959_vm2 = vcmask (!%p228_p10), 1041408   ;;  %v2825_v11 = vmov (!%p228_p10), 65535   ;;  %v2646_v13 = vld [vmem:[%s3274_s1 + $0x40] sm:$0xff] (!%p228_p10)   ;;  %s2367_s29 = sshll.u32 (!%p228_p10), %s2814_s18, 12 }
  0x11   : > { %967 = vmatprep.subr.bf16.mxu0 (!%p228_p10), %v2824_v1  ;;  %2560 = vmatprep.subr.bf16.mxu1 (!%p228_p10), %v2824_v1  ;;  %v960_v12 = vsel (!%p228_p10), %vm958_vm1, 4294967295, %v2825_v11  ;;  %v2647_v14 = vld [vmem:[%s3274_s1 + $0x48] ss:$0 sps:$4 sm:$0x33] (!%p228_p10)   ;;  %s3219_s7 = scalar_lea.hbm (!%p228_p10), %s3277_s4, %s2367_s29 }
  0x12   : > { %v961_v15 = vsel (!%p228_p10), %vm959_vm2, %v960_v12, 0 }
  0x13   : > { %v963_v16 = vand.u32 (!%p228_p10), %v2647_v14, %v961_v15  ;;  %v3044_v15 = vld [vmem:[%s3275_s2] ss:$0 sm:$0xff] (!%p228_p10) }
  0x14   : > { %968 = vmatpush1.bf16.msra.mxu0 (!%p228_p10), %v2639_v2  ;;  %2570 = vmatpush1.bf16.msra.mxu1 (!%p228_p10), %v2639_v2 }
  0x15   : > { %969 = vmatprep.subr.bf16.mxu0 (!%p228_p10), %v2824_v1  ;;  %2561 = vmatprep.subr.bf16.mxu1 (!%p228_p10), %v2824_v1 }
  0x16   : > { %s3288_s9 = smov (!%p274_p11, %s2122_s9), 255 }
  0x17   : > { %s2302_s12 = sshll.u32 %s3288_s9, 3  ;;  %s2826_s9 = smov [#allocation3]  }
  0x18   : > { %970 = vmatpush1.bf16.msra.mxu0 %v2640_v3  ;;  %2571 = vmatpush1.bf16.msra.mxu1 %v2640_v3  ;;  %s2925_s21 = scalar_lea.vmem %s3273_s0, %s2302_s12  ;;  %s2748_s10 = sshll.u32 %s2826_s9, 4  ;;  %s2749_s10 = int_to_ptr.vmem [resolvable:$false] %s2748_s10 }
  0x19   : > { %971 = vmatprep.subr.bf16.mxu0 %v2824_v1  ;;  %2562 = vmatprep.subr.bf16.mxu1 %v2824_v1  ;;  %v2650_v6 = vld [vmem:[%s2925_s21 + $0x4] ss:$8 sps:$4 sm:$0xff]   ;;  %v2648_v17 = vld [vmem:[%s2925_s21] ss:$8 sps:$4 sm:$0xff]   ;;  %v2654_v19 = vld [vmem:[%s2925_s21 + $0x14] ss:$8 sps:$4 sm:$0xff]  }
  0x1a   : > { %v2653_v7 = vld [vmem:[%s2925_s21 + $0x104] ss:$8 sps:$4 sm:$0xff]   ;;  %2199 = vmatprep.mubr.msk.bf16.mxu0 %vm861_vm0, %v2650_v6  ;;  %v2651_v18 = vld [vmem:[%s2925_s21 + $0x100] ss:$8 sps:$4 sm:$0xff]   ;;  %v2656_v20 = vld [vmem:[%s2925_s21 + $0x114] ss:$8 sps:$4 sm:$0xff]  }
  0x1b   : > { %2215 = vmatprep.mubr.msk.bf16.mxu1 %vm861_vm0, %v2653_v7  ;;  %v2658_v21 = vld [vmem:[%s2925_s21 + $0x10] ss:$8 sps:$4 sm:$0xff]   ;;  %v2660_v23 = vld [vmem:[%s2925_s21 + $0x24] ss:$8 sps:$4 sm:$0xff]   ;;  %v2664_v25 = vld [vmem:[%s2925_s21 + $0x20] ss:$8 sps:$4 sm:$0xff]  }
  0x1c   : > { %972 = vmatpush1.bf16.msra.mxu0 %v2641_v4  ;;  %2572 = vmatpush1.bf16.msra.mxu1 %v2641_v4  ;;  %v2659_v22 = vld [vmem:[%s2925_s21 + $0x110] ss:$8 sps:$4 sm:$0xff]   ;;  %v2662_v24 = vld [vmem:[%s2925_s21 + $0x124] ss:$8 sps:$4 sm:$0xff]   ;;  %v2665_v26 = vld [vmem:[%s2925_s21 + $0x120] ss:$8 sps:$4 sm:$0xff]  }
  0x1d   : > { %973 = vmatprep.subr.bf16.mxu0 %v2824_v1  ;;  %2563 = vmatprep.subr.bf16.mxu1 %v2824_v1  ;;  %v2666_v27 = vld [vmem:[%s2925_s21 + $0x34] ss:$8 sps:$4 sm:$0xff]   ;;  %v2670_v29 = vld [vmem:[%s2925_s21 + $0x30] ss:$8 sps:$4 sm:$0xff]   ;;  %v2672_v31 = vld [vmem:[%s2925_s21 + $0x44] ss:$8 sps:$4 sm:$0xff]  }
  0x1e   : > { %v2668_v28 = vld [vmem:[%s2925_s21 + $0x134] ss:$8 sps:$4 sm:$0xff]   ;;  %v2671_v30 = vld [vmem:[%s2925_s21 + $0x130] ss:$8 sps:$4 sm:$0xff]   ;;  %v2674_v32 = vld [vmem:[%s2925_s21 + $0x144] ss:$8 sps:$4 sm:$0xff]  }
  0x1f   : > { %v2676_v33 = vld [vmem:[%s2925_s21 + $0x40] ss:$8 sps:$4 sm:$0xff]   ;;  %v2678_v35 = vld [vmem:[%s2925_s21 + $0x54] ss:$8 sps:$4 sm:$0xff]   ;;  %v2682_v37 = vld [vmem:[%s2925_s21 + $0x50] ss:$8 sps:$4 sm:$0xff]  }
  0x20   : > { %974 = vmatpush1.bf16.msra.mxu0 %v2642_v5  ;;  %2573 = vmatpush1.bf16.msra.mxu1 %v2642_v5  ;;  %v2677_v34 = vld [vmem:[%s2925_s21 + $0x140] ss:$8 sps:$4 sm:$0xff]   ;;  %v2680_v36 = vld [vmem:[%s2925_s21 + $0x154] ss:$8 sps:$4 sm:$0xff]   ;;  %v2683_v38 = vld [vmem:[%s2925_s21 + $0x150] ss:$8 sps:$4 sm:$0xff]  }
  0x21   : > { %975 = vmatprep.subr.bf16.mxu0 %v2824_v1  ;;  %2564 = vmatprep.subr.bf16.mxu1 %v2824_v1  ;;  %v2684_v39 = vld [vmem:[%s2925_s21 + $0x64] ss:$8 sps:$4 sm:$0xff]   ;;  %v2688_v41 = vld [vmem:[%s2925_s21 + $0x60] ss:$8 sps:$4 sm:$0xff]   ;;  %v2690_v43 = vld [vmem:[%s2925_s21 + $0x74] ss:$8 sps:$4 sm:$0xff]  }
  0x22   : > { %v2686_v40 = vld [vmem:[%s2925_s21 + $0x164] ss:$8 sps:$4 sm:$0xff]   ;;  %v2689_v42 = vld [vmem:[%s2925_s21 + $0x160] ss:$8 sps:$4 sm:$0xff]   ;;  %v2692_v44 = vld [vmem:[%s2925_s21 + $0x174] ss:$8 sps:$4 sm:$0xff]  }
  0x23   : > { %v2694_v45 = vld [vmem:[%s2925_s21 + $0x70] ss:$8 sps:$4 sm:$0xff]   ;;  %v2696_v47 = vld [vmem:[%s2925_s21 + $0x84] ss:$8 sps:$4 sm:$0xff]   ;;  %v2700_v49 = vld [vmem:[%s2925_s21 + $0x80] ss:$8 sps:$4 sm:$0xff]  }
  0x24   : > { %976 = vmatpush1.bf16.msra.mxu0 %v2643_v8  ;;  %2574 = vmatpush1.bf16.msra.mxu1 %v2643_v8  ;;  %v2695_v46 = vld [vmem:[%s2925_s21 + $0x170] ss:$8 sps:$4 sm:$0xff]   ;;  %v2698_v48 = vld [vmem:[%s2925_s21 + $0x184] ss:$8 sps:$4 sm:$0xff]   ;;  %v2701_v50 = vld [vmem:[%s2925_s21 + $0x180] ss:$8 sps:$4 sm:$0xff]  }
  0x25   : > { %977 = vmatprep.subr.bf16.mxu0 %v2824_v1  ;;  %2565 = vmatprep.subr.bf16.mxu1 %v2824_v1  ;;  %v2702_v51 = vld [vmem:[%s2925_s21 + $0x94] ss:$8 sps:$4 sm:$0xff]   ;;  %v2706_v53 = vld [vmem:[%s2925_s21 + $0x90] ss:$8 sps:$4 sm:$0xff]   ;;  %v2708_v55 = vld [vmem:[%s2925_s21 + $0xa4] ss:$8 sps:$4 sm:$0xff]  }
  0x26   : > { %v2704_v52 = vld [vmem:[%s2925_s21 + $0x194] ss:$8 sps:$4 sm:$0xff]   ;;  %v2707_v54 = vld [vmem:[%s2925_s21 + $0x190] ss:$8 sps:$4 sm:$0xff]   ;;  %v2710_v56 = vld [vmem:[%s2925_s21 + $0x1a4] ss:$8 sps:$4 sm:$0xff]  }
  0x27   : > { %v2712_v57 = vld [vmem:[%s2925_s21 + $0xa0] ss:$8 sps:$4 sm:$0xff]   ;;  %v2714_v59 = vld [vmem:[%s2925_s21 + $0xb4] ss:$8 sps:$4 sm:$0xff]   ;;  %v2718_v61 = vld [vmem:[%s2925_s21 + $0xb0] ss:$8 sps:$4 sm:$0xff]  }
  0x28   : > { %978 = vmatpush1.bf16.msra.mxu0 %v2644_v9  ;;  %2575 = vmatpush1.bf16.msra.mxu1 %v2644_v9  ;;  %v2713_v58 = vld [vmem:[%s2925_s21 + $0x1a0] ss:$8 sps:$4 sm:$0xff]   ;;  %v2716_v60 = vld [vmem:[%s2925_s21 + $0x1b4] ss:$8 sps:$4 sm:$0xff]   ;;  %v2719_v62 = vld [vmem:[%s2925_s21 + $0x1b0] ss:$8 sps:$4 sm:$0xff]  }
  0x29   : > { %979 = vmatprep.subr.bf16.mxu0 %v2824_v1  ;;  %2566 = vmatprep.subr.bf16.mxu1 %v2824_v1  ;;  %v2720_v63 = vld [vmem:[%s2925_s21 + $0xc4] ss:$8 sps:$4 sm:$0xff]   ;;  %v2725_v2 = vld [vmem:[%s2925_s21 + $0x1c0] ss:$8 sps:$4 sm:$0xff]   ;;  %v2726_v3 = vld [vmem:[%s2925_s21 + $0xd4] ss:$8 sps:$4 sm:$0xff]  }
  0x2a   : > { %v2722_v0 = vld [vmem:[%s2925_s21 + $0x1c4] ss:$8 sps:$4 sm:$0xff]   ;;  %v2728_v4 = vld [vmem:[%s2925_s21 + $0x1d4] ss:$8 sps:$4 sm:$0xff]   ;;  %v2730_v5 = vld [vmem:[%s2925_s21 + $0xd0] ss:$8 sps:$4 sm:$0xff]  }
  0x2b   : > { %v2731_v6 = vld [vmem:[%s2925_s21 + $0x1d0] ss:$8 sps:$4 sm:$0xff]   ;;  %v2732_v7 = vld [vmem:[%s2925_s21 + $0xe4] ss:$8 sps:$4 sm:$0xff]   ;;  %v2736_v9 = vld [vmem:[%s2925_s21 + $0xe0] ss:$8 sps:$4 sm:$0xff]  }
  0x2c   : > { %980 = vmatpush1.bf16.msra.mxu0 %v2645_v10  ;;  %2576 = vmatpush1.bf16.msra.mxu1 %v2645_v10  ;;  %v2734_v8 = vld [vmem:[%s2925_s21 + $0x1e4] ss:$8 sps:$4 sm:$0xff]   ;;  %v2737_v10 = vld [vmem:[%s2925_s21 + $0x1e0] ss:$8 sps:$4 sm:$0xff]   ;;  %v2738_v11 = vld [vmem:[%s2925_s21 + $0xf4] ss:$8 sps:$4 sm:$0xff]  }
  0x2d   : > { %981 = vmatprep.subr.bf16.mxu0 %v2824_v1  ;;  %2567 = vmatprep.subr.bf16.mxu1 %v2824_v1  ;;  %v2740_v12 = vld [vmem:[%s2925_s21 + $0x1f4] ss:$8 sps:$4 sm:$0xff]   ;;  %v2743_v14 = vld [vmem:[%s2925_s21 + $0x1f0] ss:$8 sps:$4 sm:$0xff]   ;;  %s2750_s11 = scalar_lea.vmem %s2749_s10, 8192 }
  0x30   : > { %982 = vmatpush1.bf16.msra.mxu0 %v2646_v13  ;;  %2577 = vmatpush1.bf16.msra.mxu1 %v2646_v13  ;;  %v2742_v13 = vld [vmem:[%s2925_s21 + $0xf0] ss:$8 sps:$4 sm:$0xff]  }
  0x31   : > { %983 = vmatprep.subr.bf16.mxu0 %v2824_v1  ;;  %2568 = vmatprep.subr.bf16.mxu1 %v2824_v1  ;;  %v2724_v1 = vld [vmem:[%s2925_s21 + $0xc0] ss:$8 sps:$4 sm:$0xff]   ;;  %s269_s21 = sand.u32 1, %s2806_s16  }
  0x32   : > { %s2121_s24 = sshll.u32 %s269_s21, 8  ;;  %s3227_s18 = scalar_lea.sflag [#allocation4], %s269_s21 }
  0x33   : > { %s3064_s26 = scalar_lea.vmem [#allocation3], %s2121_s24 }
  0x34   : > { %984 = vmatpush1.bf16.msra.mxu0 %v963_v16  ;;  %2578 = vmatpush1.bf16.msra.mxu1 %v963_v16  ;;  %s1990_s30 = sshll.u32 %s3064_s26, 4  ;;  %s3221_s30 = int_to_ptr.vmem [resolvable:$true] %s1990_s30 }
  0x35   : > { %s2744_s8 = scalar_lea.vmem %s3221_s30, 4096  ;;  %p2751_p1 = scmp.lt.s32.totalorder %s3221_s30, %s2749_s10 }
  0x36   : > { %p2745_p12 = scmp.ne.s32.totalorder %s3221_s30, %s2744_s8  ;;  %p2752_p2 = scmp.lt.s32.totalorder %s2750_s11, %s2744_s8 }
  0x37   : > { %998 = vmatmul.mubr.bf16.vlgmr.msra.gmra.mrb[0].mxu0 %v2648_v17  ;;  %1126 = vmatmul.mubr.bf16.vlgmr.msra.gmra.mrb[0].mxu1 %v2651_v18  ;;  %v3049_v17 = vld [vmem:[%s3276_s3] ss:$0 sm:$0xff] }
  0x38   : > { %2200 = vmatprep.mubr.msk.bf16.mxu0 %vm861_vm0, %v2654_v19  ;;  %2216 = vmatprep.mubr.msk.bf16.mxu1 %vm861_vm0, %v2656_v20  ;;  %p2746_p13 = pnand %p2745_p12, %p2894_p4  ;;  %p2753_p3 = por %p2752_p2, %p2751_p1 }
  0x3a   : > { %p2747_p0 = pneg %p2746_p13 }
  0x3c   : > { %p2754_p5 = pnand %p2753_p3, %p2747_p0 }
  0x3f   : > { %1006 = vmatmul.mubr.bf16.gmra.mrb[4].mxu0 %v2658_v21  ;;  %1134 = vmatmul.mubr.bf16.gmra.mrb[4].mxu1 %v2659_v22 }
  0x40   : > { %2201 = vmatprep.mubr.msk.bf16.mxu0 %vm861_vm0, %v2660_v23  ;;  %2217 = vmatprep.mubr.msk.bf16.mxu1 %vm861_vm0, %v2662_v24 }
  0x47   : > { %1014 = vmatmul.mubr.bf16.gmra.mrb[8].mxu0 %v2664_v25  ;;  %1142 = vmatmul.mubr.bf16.gmra.mrb[8].mxu1 %v2665_v26 }
  0x48   : > { %2202 = vmatprep.mubr.msk.bf16.mxu0 %vm861_vm0, %v2666_v27  ;;  %2218 = vmatprep.mubr.msk.bf16.mxu1 %vm861_vm0, %v2668_v28 }
  0x4f   : > { %1022 = vmatmul.mubr.bf16.gmra.mrb[12].mxu0 %v2670_v29  ;;  %1150 = vmatmul.mubr.bf16.gmra.mrb[12].mxu1 %v2671_v30 }
  0x50   : > { %2203 = vmatprep.mubr.msk.bf16.mxu0 %vm861_vm0, %v2672_v31  ;;  %2219 = vmatprep.mubr.msk.bf16.mxu1 %vm861_vm0, %v2674_v32 }
  0x57   : > { %1030 = vmatmul.mubr.bf16.gmra.mrb[16].mxu0 %v2676_v33  ;;  %1158 = vmatmul.mubr.bf16.gmra.mrb[16].mxu1 %v2677_v34 }
  0x58   : > { %2204 = vmatprep.mubr.msk.bf16.mxu0 %vm861_vm0, %v2678_v35  ;;  %2220 = vmatprep.mubr.msk.bf16.mxu1 %vm861_vm0, %v2680_v36 }
  0x5f   : > { %1038 = vmatmul.mubr.bf16.gmra.mrb[20].mxu0 %v2682_v37  ;;  %1166 = vmatmul.mubr.bf16.gmra.mrb[20].mxu1 %v2683_v38 }
  0x60   : > { %2205 = vmatprep.mubr.msk.bf16.mxu0 %vm861_vm0, %v2684_v39  ;;  %2221 = vmatprep.mubr.msk.bf16.mxu1 %vm861_vm0, %v2686_v40 }
  0x67   : > { %1046 = vmatmul.mubr.bf16.gmra.mrb[24].mxu0 %v2688_v41  ;;  %1174 = vmatmul.mubr.bf16.gmra.mrb[24].mxu1 %v2689_v42 }
  0x68   : > { %2206 = vmatprep.mubr.msk.bf16.mxu0 %vm861_vm0, %v2690_v43  ;;  %2222 = vmatprep.mubr.msk.bf16.mxu1 %vm861_vm0, %v2692_v44 }
  0x6f   : > { %1054 = vmatmul.mubr.bf16.gmra.mrb[28].mxu0 %v2694_v45  ;;  %1182 = vmatmul.mubr.bf16.gmra.mrb[28].mxu1 %v2695_v46 }
  0x70   : > { %2207 = vmatprep.mubr.msk.bf16.mxu0 %vm861_vm0, %v2696_v47  ;;  %2223 = vmatprep.mubr.msk.bf16.mxu1 %vm861_vm0, %v2698_v48 }
  0x77   : > { %1062 = vmatmul.mubr.bf16.gmra.mrb[32].mxu0 %v2700_v49  ;;  %1190 = vmatmul.mubr.bf16.gmra.mrb[32].mxu1 %v2701_v50 }
  0x78   : > { %2208 = vmatprep.mubr.msk.bf16.mxu0 %vm861_vm0, %v2702_v51  ;;  %2224 = vmatprep.mubr.msk.bf16.mxu1 %vm861_vm0, %v2704_v52 }
  0x7f   : > { %1070 = vmatmul.mubr.bf16.gmra.mrb[36].mxu0 %v2706_v53  ;;  %1198 = vmatmul.mubr.bf16.gmra.mrb[36].mxu1 %v2707_v54 }
  0x80   : > { %2209 = vmatprep.mubr.msk.bf16.mxu0 %vm861_vm0, %v2708_v55  ;;  %2225 = vmatprep.mubr.msk.bf16.mxu1 %vm861_vm0, %v2710_v56 }
  0x87   : > { %1078 = vmatmul.mubr.bf16.gmra.mrb[40].mxu0 %v2712_v57  ;;  %1206 = vmatmul.mubr.bf16.gmra.mrb[40].mxu1 %v2713_v58 }
  0x88   : > { %2210 = vmatprep.mubr.msk.bf16.mxu0 %vm861_vm0, %v2714_v59  ;;  %2226 = vmatprep.mubr.msk.bf16.mxu1 %vm861_vm0, %v2716_v60 }
  0x8f   : > { %1086 = vmatmul.mubr.bf16.gmra.mrb[44].mxu0 %v2718_v61  ;;  %1214 = vmatmul.mubr.bf16.gmra.mrb[44].mxu1 %v2719_v62 }
  0x90   : > { %2211 = vmatprep.mubr.msk.bf16.mxu0 %vm861_vm0, %v2720_v63  ;;  %2227 = vmatprep.mubr.msk.bf16.mxu1 %vm861_vm0, %v2722_v0 }
  0x97   : > { %1094 = vmatmul.mubr.bf16.gmra.mrb[48].mxu0 %v2724_v1  ;;  %1222 = vmatmul.mubr.bf16.gmra.mrb[48].mxu1 %v2725_v2 }
  0x98   : > { %2212 = vmatprep.mubr.msk.bf16.mxu0 %vm861_vm0, %v2726_v3  ;;  %2228 = vmatprep.mubr.msk.bf16.mxu1 %vm861_vm0, %v2728_v4 }
  0x9f   : > { %1102 = vmatmul.mubr.bf16.gmra.mrb[52].mxu0 %v2730_v5  ;;  %1230 = vmatmul.mubr.bf16.gmra.mrb[52].mxu1 %v2731_v6 }
  0xa0   : > { %2213 = vmatprep.mubr.msk.bf16.mxu0 %vm861_vm0, %v2732_v7  ;;  %2229 = vmatprep.mubr.msk.bf16.mxu1 %vm861_vm0, %v2734_v8 }
  0xa7   : > { %1110 = vmatmul.mubr.bf16.gmra.mrb[56].mxu0 %v2736_v9  ;;  %1238 = vmatmul.mubr.bf16.gmra.mrb[56].mxu1 %v2737_v10 }
  0xa8   : > { %2214 = vmatprep.mubr.msk.bf16.mxu0 %vm861_vm0, %v2738_v11  ;;  %2230 = vmatprep.mubr.msk.bf16.mxu1 %vm861_vm0, %v2740_v12 }
  0xaf   : > { %1118 = vmatmul.mubr.bf16.gmra.mrb[60].mxu0 %v2742_v13  ;;  %1246 = vmatmul.mubr.bf16.gmra.mrb[60].mxu1 %v2743_v14 }
 0x10a   : > { %v999_v16 = vpop.f32.mrb[0].mxu0  ;;  %v1127_v18 = vpop.f32.mrb[0].mxu1 }
 0x10b   : > { %v1456_v19 = vmul.f32 %v3044_v15, %v999_v16  ;;  %v1488_v20 = vmul.f32 %v3044_v15, %v1127_v18  ;;  %v1001_v21 = vpop.f32.mrb[1].mxu0  ;;  %v1129_v22 = vpop.f32.mrb[1].mxu1 }
 0x10c   : > { %v1002_v23 = vpop.f32.mrb[2].mxu0  ;;  %v1130_v24 = vpop.f32.mrb[2].mxu1 }
 0x10d   : > { %v1527_v25 = vadd.f32 %v3049_v17, %v1456_v19  ;;  %v1559_v26 = vadd.f32 %v3049_v17, %v1488_v20  ;;  %v1457_v27 = vmul.f32 %v3044_v15, %v1002_v23  ;;  %v1489_v28 = vmul.f32 %v3044_v15, %v1130_v24  ;;  %v1004_v29 = vpop.f32.mrb[3].mxu0  ;;  %v1132_v30 = vpop.f32.mrb[3].mxu1 }
 0x10f   : > { %v1528_v31 = vadd.f32 %v3049_v17, %v1457_v27  ;;  %v1560_v32 = vadd.f32 %v3049_v17, %v1489_v28  ;;  %v1591_v33 = vmax.f32 %v1527_v25, 0.0  ;;  %v1623_v34 = vmax.f32 %v1559_v26, 0.0 }
 0x111   : > { %v1592_v35 = vmax.f32 %v1528_v31, 0.0  ;;  %v1624_v36 = vmax.f32 %v1560_v32, 0.0 }
 0x112   : > { %v1007_v37 = vpop.f32.mrb[4].mxu0  ;;  %v1135_v38 = vpop.f32.mrb[4].mxu1 }
 0x113   : > { %v2371_v39 = vpack.c.bf16 %v1592_v35, %v1591_v33  ;;  %v2451_v40 = vpack.c.bf16 %v1624_v36, %v1623_v34  ;;  %v1458_v41 = vmul.f32 %v3044_v15, %v1007_v37  ;;  %v1490_v42 = vmul.f32 %v3044_v15, %v1135_v38  ;;  %v1009_v43 = vpop.f32.mrb[5].mxu0  ;;  %v1137_v44 = vpop.f32.mrb[5].mxu1 }
 0x114   : > { %v1010_v45 = vpop.f32.mrb[6].mxu0  ;;  %v1138_v46 = vpop.f32.mrb[6].mxu1 }
 0x115   : > { %2372 = vst [vmem:[%s3064_s26] sm:$0xff] %v2371_v39   ;;  %2543 = vst [vmem:[%s3064_s26 + $0x80] sm:$0xff] %v2451_v40   ;;  %v1529_v47 = vadd.f32 %v3049_v17, %v1458_v41  ;;  %v1561_v48 = vadd.f32 %v3049_v17, %v1490_v42  ;;  %v1459_v49 = vmul.f32 %v3044_v15, %v1010_v45  ;;  %v1012_v51 = vpop.f32.mrb[7].mxu0  ;;  %v1140_v52 = vpop.f32.mrb[7].mxu1 }
 0x116   : > { %v1491_v50 = vmul.f32 %v3044_v15, %v1138_v46 }
 0x117   : > { %v1530_v53 = vadd.f32 %v3049_v17, %v1459_v49  ;;  %v1593_v55 = vmax.f32 %v1529_v47, 0.0  ;;  %v1625_v56 = vmax.f32 %v1561_v48, 0.0 }
 0x118   : > { %v1562_v54 = vadd.f32 %v3049_v17, %v1491_v50 }
 0x119   : > { %v1594_v57 = vmax.f32 %v1530_v53, 0.0 }
 0x11a   : > { %v1626_v58 = vmax.f32 %v1562_v54, 0.0  ;;  %v1015_v59 = vpop.f32.mrb[8].mxu0  ;;  %v1143_v60 = vpop.f32.mrb[8].mxu1 }
 0x11b   : > { %v2376_v61 = vpack.c.bf16 %v1594_v57, %v1593_v55  ;;  %v1460_v63 = vmul.f32 %v3044_v15, %v1015_v59  ;;  %v1492_v0 = vmul.f32 %v3044_v15, %v1143_v60  ;;  %v1017_v1 = vpop.f32.mrb[9].mxu0  ;;  %v1145_v2 = vpop.f32.mrb[9].mxu1 }
 0x11c   : > { %v2456_v62 = vpack.c.bf16 %v1626_v58, %v1625_v56  ;;  %v1018_v3 = vpop.f32.mrb[10].mxu0  ;;  %v1146_v4 = vpop.f32.mrb[10].mxu1 }
 0x11d   : > { %2528 = vst [vmem:[%s3064_s26 + $0x8] sm:$0xff] %v2376_v61   ;;  %v1531_v5 = vadd.f32 %v3049_v17, %v1460_v63  ;;  %v1563_v6 = vadd.f32 %v3049_v17, %v1492_v0  ;;  %v1461_v7 = vmul.f32 %v3044_v15, %v1018_v3  ;;  %v1493_v8 = vmul.f32 %v3044_v15, %v1146_v4  ;;  %v1020_v9 = vpop.f32.mrb[11].mxu0  ;;  %v1148_v10 = vpop.f32.mrb[11].mxu1 }
 0x11e   : > { %2544 = vst [vmem:[%s3064_s26 + $0x88] sm:$0xff] %v2456_v62  }
 0x11f   : > { %v1532_v11 = vadd.f32 %v3049_v17, %v1461_v7  ;;  %v1564_v12 = vadd.f32 %v3049_v17, %v1493_v8  ;;  %v1595_v13 = vmax.f32 %v1531_v5, 0.0  ;;  %v1627_v14 = vmax.f32 %v1563_v6, 0.0 }
 0x121   : > { %v1596_v16 = vmax.f32 %v1532_v11, 0.0  ;;  %v1628_v18 = vmax.f32 %v1564_v12, 0.0 }
 0x122   : > { %v1023_v19 = vpop.f32.mrb[12].mxu0  ;;  %v1151_v20 = vpop.f32.mrb[12].mxu1 }
 0x123   : > { %v2381_v21 = vpack.c.bf16 %v1596_v16, %v1595_v13  ;;  %v2461_v22 = vpack.c.bf16 %v1628_v18, %v1627_v14  ;;  %v1462_v23 = vmul.f32 %v3044_v15, %v1023_v19  ;;  %v1494_v24 = vmul.f32 %v3044_v15, %v1151_v20  ;;  %v1025_v25 = vpop.f32.mrb[13].mxu0  ;;  %v1153_v26 = vpop.f32.mrb[13].mxu1 }
 0x124   : > { %v1026_v27 = vpop.f32.mrb[14].mxu0  ;;  %v1154_v28 = vpop.f32.mrb[14].mxu1 }
 0x125   : > { %2529 = vst [vmem:[%s3064_s26 + $0x10] sm:$0xff] %v2381_v21   ;;  %2545 = vst [vmem:[%s3064_s26 + $0x90] sm:$0xff] %v2461_v22   ;;  %v1533_v29 = vadd.f32 %v3049_v17, %v1462_v23  ;;  %v1565_v30 = vadd.f32 %v3049_v17, %v1494_v24  ;;  %v1463_v31 = vmul.f32 %v3044_v15, %v1026_v27  ;;  %v1028_v33 = vpop.f32.mrb[15].mxu0  ;;  %v1156_v34 = vpop.f32.mrb[15].mxu1 }
 0x126   : > { %v1495_v32 = vmul.f32 %v3044_v15, %v1154_v28 }
 0x127   : > { %v1534_v35 = vadd.f32 %v3049_v17, %v1463_v31  ;;  %v1597_v37 = vmax.f32 %v1533_v29, 0.0  ;;  %v1629_v38 = vmax.f32 %v1565_v30, 0.0 }
 0x128   : > { %v1566_v36 = vadd.f32 %v3049_v17, %v1495_v32 }
 0x129   : > { %v1598_v39 = vmax.f32 %v1534_v35, 0.0 }
 0x12a   : > { %v1630_v40 = vmax.f32 %v1566_v36, 0.0  ;;  %v1031_v41 = vpop.f32.mrb[16].mxu0  ;;  %v1159_v42 = vpop.f32.mrb[16].mxu1 }
 0x12b   : > { %v2386_v43 = vpack.c.bf16 %v1598_v39, %v1597_v37  ;;  %v1464_v45 = vmul.f32 %v3044_v15, %v1031_v41  ;;  %v1496_v46 = vmul.f32 %v3044_v15, %v1159_v42  ;;  %v1033_v47 = vpop.f32.mrb[17].mxu0  ;;  %v1161_v48 = vpop.f32.mrb[17].mxu1 }
 0x12c   : > { %v2466_v44 = vpack.c.bf16 %v1630_v40, %v1629_v38  ;;  %v1034_v49 = vpop.f32.mrb[18].mxu0  ;;  %v1162_v50 = vpop.f32.mrb[18].mxu1 }
 0x12d   : > { %2530 = vst [vmem:[%s3064_s26 + $0x18] sm:$0xff] %v2386_v43   ;;  %v1535_v51 = vadd.f32 %v3049_v17, %v1464_v45  ;;  %v1567_v52 = vadd.f32 %v3049_v17, %v1496_v46  ;;  %v1465_v53 = vmul.f32 %v3044_v15, %v1034_v49  ;;  %v1497_v54 = vmul.f32 %v3044_v15, %v1162_v50  ;;  %v1036_v55 = vpop.f32.mrb[19].mxu0  ;;  %v1164_v56 = vpop.f32.mrb[19].mxu1 }
 0x12e   : > { %2546 = vst [vmem:[%s3064_s26 + $0x98] sm:$0xff] %v2466_v44  }
 0x12f   : > { %v1536_v57 = vadd.f32 %v3049_v17, %v1465_v53  ;;  %v1568_v58 = vadd.f32 %v3049_v17, %v1497_v54  ;;  %v1599_v59 = vmax.f32 %v1535_v51, 0.0  ;;  %v1631_v60 = vmax.f32 %v1567_v52, 0.0 }
 0x131   : > { %v1600_v61 = vmax.f32 %v1536_v57, 0.0  ;;  %v1632_v62 = vmax.f32 %v1568_v58, 0.0 }
 0x132   : > { %v1039_v63 = vpop.f32.mrb[20].mxu0  ;;  %v1167_v0 = vpop.f32.mrb[20].mxu1 }
 0x133   : > { %v2391_v1 = vpack.c.bf16 %v1600_v61, %v1599_v59  ;;  %v2471_v2 = vpack.c.bf16 %v1632_v62, %v1631_v60  ;;  %v1466_v3 = vmul.f32 %v3044_v15, %v1039_v63  ;;  %v1498_v4 = vmul.f32 %v3044_v15, %v1167_v0  ;;  %v1041_v5 = vpop.f32.mrb[21].mxu0  ;;  %v1169_v6 = vpop.f32.mrb[21].mxu1 }
 0x134   : > { %v1042_v7 = vpop.f32.mrb[22].mxu0  ;;  %v1170_v8 = vpop.f32.mrb[22].mxu1 }
 0x135   : > { %2531 = vst [vmem:[%s3064_s26 + $0x20] sm:$0xff] %v2391_v1   ;;  %2547 = vst [vmem:[%s3064_s26 + $0xa0] sm:$0xff] %v2471_v2   ;;  %v1537_v9 = vadd.f32 %v3049_v17, %v1466_v3  ;;  %v1569_v10 = vadd.f32 %v3049_v17, %v1498_v4  ;;  %v1467_v11 = vmul.f32 %v3044_v15, %v1042_v7  ;;  %v1044_v13 = vpop.f32.mrb[23].mxu0  ;;  %v1172_v14 = vpop.f32.mrb[23].mxu1 }
 0x136   : > { %v1499_v12 = vmul.f32 %v3044_v15, %v1170_v8 }
 0x137   : > { %v1538_v16 = vadd.f32 %v3049_v17, %v1467_v11  ;;  %v1601_v19 = vmax.f32 %v1537_v9, 0.0  ;;  %v1633_v20 = vmax.f32 %v1569_v10, 0.0 }
 0x138   : > { %v1570_v18 = vadd.f32 %v3049_v17, %v1499_v12 }
 0x139   : > { %v1602_v21 = vmax.f32 %v1538_v16, 0.0 }
 0x13a   : > { %v1634_v22 = vmax.f32 %v1570_v18, 0.0  ;;  %v1047_v23 = vpop.f32.mrb[24].mxu0  ;;  %v1175_v24 = vpop.f32.mrb[24].mxu1 }
 0x13b   : > { %v2396_v25 = vpack.c.bf16 %v1602_v21, %v1601_v19  ;;  %v1468_v27 = vmul.f32 %v3044_v15, %v1047_v23  ;;  %v1500_v28 = vmul.f32 %v3044_v15, %v1175_v24  ;;  %v1049_v29 = vpop.f32.mrb[25].mxu0  ;;  %v1177_v30 = vpop.f32.mrb[25].mxu1 }
 0x13c   : > { %v2476_v26 = vpack.c.bf16 %v1634_v22, %v1633_v20  ;;  %v1050_v31 = vpop.f32.mrb[26].mxu0  ;;  %v1178_v32 = vpop.f32.mrb[26].mxu1 }
 0x13d   : > { %2532 = vst [vmem:[%s3064_s26 + $0x28] sm:$0xff] %v2396_v25   ;;  %v1539_v33 = vadd.f32 %v3049_v17, %v1468_v27  ;;  %v1571_v34 = vadd.f32 %v3049_v17, %v1500_v28  ;;  %v1469_v35 = vmul.f32 %v3044_v15, %v1050_v31  ;;  %v1501_v36 = vmul.f32 %v3044_v15, %v1178_v32  ;;  %v1052_v37 = vpop.f32.mrb[27].mxu0  ;;  %v1180_v38 = vpop.f32.mrb[27].mxu1 }
 0x13e   : > { %2548 = vst [vmem:[%s3064_s26 + $0xa8] sm:$0xff] %v2476_v26  }
 0x13f   : > { %v1540_v39 = vadd.f32 %v3049_v17, %v1469_v35  ;;  %v1572_v40 = vadd.f32 %v3049_v17, %v1501_v36  ;;  %v1603_v41 = vmax.f32 %v1539_v33, 0.0  ;;  %v1635_v42 = vmax.f32 %v1571_v34, 0.0 }
 0x141   : > { %v1604_v43 = vmax.f32 %v1540_v39, 0.0  ;;  %v1636_v44 = vmax.f32 %v1572_v40, 0.0 }
 0x142   : > { %v1055_v45 = vpop.f32.mrb[28].mxu0  ;;  %v1183_v46 = vpop.f32.mrb[28].mxu1 }
 0x143   : > { %v2401_v47 = vpack.c.bf16 %v1604_v43, %v1603_v41  ;;  %v2481_v48 = vpack.c.bf16 %v1636_v44, %v1635_v42  ;;  %v1470_v49 = vmul.f32 %v3044_v15, %v1055_v45  ;;  %v1502_v50 = vmul.f32 %v3044_v15, %v1183_v46  ;;  %v1057_v51 = vpop.f32.mrb[29].mxu0  ;;  %v1185_v52 = vpop.f32.mrb[29].mxu1 }
 0x144   : > { %v1058_v53 = vpop.f32.mrb[30].mxu0  ;;  %v1186_v54 = vpop.f32.mrb[30].mxu1 }
 0x145   : > { %2533 = vst [vmem:[%s3064_s26 + $0x30] sm:$0xff] %v2401_v47   ;;  %2549 = vst [vmem:[%s3064_s26 + $0xb0] sm:$0xff] %v2481_v48   ;;  %v1541_v55 = vadd.f32 %v3049_v17, %v1470_v49  ;;  %v1573_v56 = vadd.f32 %v3049_v17, %v1502_v50  ;;  %v1471_v57 = vmul.f32 %v3044_v15, %v1058_v53  ;;  %v1060_v59 = vpop.f32.mrb[31].mxu0  ;;  %v1188_v60 = vpop.f32.mrb[31].mxu1 }
 0x146   : > { %v1503_v58 = vmul.f32 %v3044_v15, %v1186_v54 }
 0x147   : > { %v1542_v61 = vadd.f32 %v3049_v17, %v1471_v57  ;;  %v1605_v63 = vmax.f32 %v1541_v55, 0.0  ;;  %v1637_v0 = vmax.f32 %v1573_v56, 0.0 }
 0x148   : > { %v1574_v62 = vadd.f32 %v3049_v17, %v1503_v58 }
 0x149   : > { %v1606_v1 = vmax.f32 %v1542_v61, 0.0 }
 0x14a   : > { %v1638_v2 = vmax.f32 %v1574_v62, 0.0  ;;  %v1063_v3 = vpop.f32.mrb[32].mxu0  ;;  %v1191_v4 = vpop.f32.mrb[32].mxu1 }
 0x14b   : > { %v2406_v5 = vpack.c.bf16 %v1606_v1, %v1605_v63  ;;  %v1472_v7 = vmul.f32 %v3044_v15, %v1063_v3  ;;  %v1504_v8 = vmul.f32 %v3044_v15, %v1191_v4  ;;  %v1065_v9 = vpop.f32.mrb[33].mxu0  ;;  %v1193_v10 = vpop.f32.mrb[33].mxu1 }
 0x14c   : > { %v2486_v6 = vpack.c.bf16 %v1638_v2, %v1637_v0  ;;  %v1066_v11 = vpop.f32.mrb[34].mxu0  ;;  %v1194_v12 = vpop.f32.mrb[34].mxu1 }
 0x14d   : > { %2534 = vst [vmem:[%s3064_s26 + $0x38] sm:$0xff] %v2406_v5   ;;  %v1543_v13 = vadd.f32 %v3049_v17, %v1472_v7  ;;  %v1575_v14 = vadd.f32 %v3049_v17, %v1504_v8  ;;  %v1473_v16 = vmul.f32 %v3044_v15, %v1066_v11  ;;  %v1505_v18 = vmul.f32 %v3044_v15, %v1194_v12  ;;  %v1068_v19 = vpop.f32.mrb[35].mxu0  ;;  %v1196_v20 = vpop.f32.mrb[35].mxu1 }
 0x14e   : > { %2550 = vst [vmem:[%s3064_s26 + $0xb8] sm:$0xff] %v2486_v6  }
 0x14f   : > { %v1544_v21 = vadd.f32 %v3049_v17, %v1473_v16  ;;  %v1576_v22 = vadd.f32 %v3049_v17, %v1505_v18  ;;  %v1607_v23 = vmax.f32 %v1543_v13, 0.0  ;;  %v1639_v24 = vmax.f32 %v1575_v14, 0.0 }
 0x151   : > { %v1608_v25 = vmax.f32 %v1544_v21, 0.0  ;;  %v1640_v26 = vmax.f32 %v1576_v22, 0.0 }
 0x152   : > { %v1071_v27 = vpop.f32.mrb[36].mxu0  ;;  %v1199_v28 = vpop.f32.mrb[36].mxu1 }
 0x153   : > { %v2411_v29 = vpack.c.bf16 %v1608_v25, %v1607_v23  ;;  %v2491_v30 = vpack.c.bf16 %v1640_v26, %v1639_v24  ;;  %v1474_v31 = vmul.f32 %v3044_v15, %v1071_v27  ;;  %v1506_v32 = vmul.f32 %v3044_v15, %v1199_v28  ;;  %v1073_v33 = vpop.f32.mrb[37].mxu0  ;;  %v1201_v34 = vpop.f32.mrb[37].mxu1 }
 0x154   : > { %v1074_v35 = vpop.f32.mrb[38].mxu0  ;;  %v1202_v36 = vpop.f32.mrb[38].mxu1 }
 0x155   : > { %2535 = vst [vmem:[%s3064_s26 + $0x40] sm:$0xff] %v2411_v29   ;;  %2551 = vst [vmem:[%s3064_s26 + $0xc0] sm:$0xff] %v2491_v30   ;;  %v1545_v37 = vadd.f32 %v3049_v17, %v1474_v31  ;;  %v1577_v38 = vadd.f32 %v3049_v17, %v1506_v32  ;;  %v1475_v39 = vmul.f32 %v3044_v15, %v1074_v35  ;;  %v1076_v41 = vpop.f32.mrb[39].mxu0  ;;  %v1204_v42 = vpop.f32.mrb[39].mxu1 }
 0x156   : > { %v1507_v40 = vmul.f32 %v3044_v15, %v1202_v36 }
 0x157   : > { %v1546_v43 = vadd.f32 %v3049_v17, %v1475_v39  ;;  %v1609_v45 = vmax.f32 %v1545_v37, 0.0  ;;  %v1641_v46 = vmax.f32 %v1577_v38, 0.0 }
 0x158   : > { %v1578_v44 = vadd.f32 %v3049_v17, %v1507_v40 }
 0x159   : > { %v1610_v47 = vmax.f32 %v1546_v43, 0.0 }
 0x15a   : > { %v1642_v48 = vmax.f32 %v1578_v44, 0.0  ;;  %v1079_v49 = vpop.f32.mrb[40].mxu0  ;;  %v1207_v50 = vpop.f32.mrb[40].mxu1 }
 0x15b   : > { %v2416_v51 = vpack.c.bf16 %v1610_v47, %v1609_v45  ;;  %v1476_v53 = vmul.f32 %v3044_v15, %v1079_v49  ;;  %v1508_v54 = vmul.f32 %v3044_v15, %v1207_v50  ;;  %v1081_v55 = vpop.f32.mrb[41].mxu0  ;;  %v1209_v56 = vpop.f32.mrb[41].mxu1 }
 0x15c   : > { %v2496_v52 = vpack.c.bf16 %v1642_v48, %v1641_v46  ;;  %v1082_v57 = vpop.f32.mrb[42].mxu0  ;;  %v1210_v58 = vpop.f32.mrb[42].mxu1 }
 0x15d   : > { %2536 = vst [vmem:[%s3064_s26 + $0x48] sm:$0xff] %v2416_v51   ;;  %v1547_v59 = vadd.f32 %v3049_v17, %v1476_v53  ;;  %v1579_v60 = vadd.f32 %v3049_v17, %v1508_v54  ;;  %v1477_v61 = vmul.f32 %v3044_v15, %v1082_v57  ;;  %v1509_v62 = vmul.f32 %v3044_v15, %v1210_v58  ;;  %v1084_v63 = vpop.f32.mrb[43].mxu0  ;;  %v1212_v0 = vpop.f32.mrb[43].mxu1 }
 0x15e   : > { %2552 = vst [vmem:[%s3064_s26 + $0xc8] sm:$0xff] %v2496_v52  }
 0x15f   : > { %v1548_v1 = vadd.f32 %v3049_v17, %v1477_v61  ;;  %v1580_v2 = vadd.f32 %v3049_v17, %v1509_v62  ;;  %v1611_v3 = vmax.f32 %v1547_v59, 0.0  ;;  %v1643_v4 = vmax.f32 %v1579_v60, 0.0 }
 0x161   : > { %v1612_v5 = vmax.f32 %v1548_v1, 0.0  ;;  %v1644_v6 = vmax.f32 %v1580_v2, 0.0 }
 0x162   : > { %v1087_v7 = vpop.f32.mrb[44].mxu0  ;;  %v1215_v8 = vpop.f32.mrb[44].mxu1 }
 0x163   : > { %v2421_v9 = vpack.c.bf16 %v1612_v5, %v1611_v3  ;;  %v2501_v10 = vpack.c.bf16 %v1644_v6, %v1643_v4  ;;  %v1478_v11 = vmul.f32 %v3044_v15, %v1087_v7  ;;  %v1510_v12 = vmul.f32 %v3044_v15, %v1215_v8  ;;  %v1089_v13 = vpop.f32.mrb[45].mxu0  ;;  %v1217_v14 = vpop.f32.mrb[45].mxu1 }
 0x164   : > { %v1090_v16 = vpop.f32.mrb[46].mxu0  ;;  %v1218_v18 = vpop.f32.mrb[46].mxu1 }
 0x165   : > { %2537 = vst [vmem:[%s3064_s26 + $0x50] sm:$0xff] %v2421_v9   ;;  %2553 = vst [vmem:[%s3064_s26 + $0xd0] sm:$0xff] %v2501_v10   ;;  %v1549_v19 = vadd.f32 %v3049_v17, %v1478_v11  ;;  %v1581_v20 = vadd.f32 %v3049_v17, %v1510_v12  ;;  %v1479_v21 = vmul.f32 %v3044_v15, %v1090_v16  ;;  %v1092_v23 = vpop.f32.mrb[47].mxu0  ;;  %v1220_v24 = vpop.f32.mrb[47].mxu1 }
 0x166   : > { %v1511_v22 = vmul.f32 %v3044_v15, %v1218_v18 }
 0x167   : > { %v1550_v25 = vadd.f32 %v3049_v17, %v1479_v21  ;;  %v1613_v27 = vmax.f32 %v1549_v19, 0.0  ;;  %v1645_v28 = vmax.f32 %v1581_v20, 0.0 }
 0x168   : > { %v1582_v26 = vadd.f32 %v3049_v17, %v1511_v22 }
 0x169   : > { %v1614_v29 = vmax.f32 %v1550_v25, 0.0 }
 0x16a   : > { %v1646_v30 = vmax.f32 %v1582_v26, 0.0  ;;  %v1095_v31 = vpop.f32.mrb[48].mxu0  ;;  %v1223_v32 = vpop.f32.mrb[48].mxu1 }
 0x16b   : > { %v2426_v33 = vpack.c.bf16 %v1614_v29, %v1613_v27  ;;  %v1480_v35 = vmul.f32 %v3044_v15, %v1095_v31  ;;  %v1512_v36 = vmul.f32 %v3044_v15, %v1223_v32  ;;  %v1097_v37 = vpop.f32.mrb[49].mxu0  ;;  %v1225_v38 = vpop.f32.mrb[49].mxu1 }
 0x16c   : > { %v2506_v34 = vpack.c.bf16 %v1646_v30, %v1645_v28  ;;  %v1098_v39 = vpop.f32.mrb[50].mxu0  ;;  %v1226_v40 = vpop.f32.mrb[50].mxu1 }
 0x16d   : > { %2538 = vst [vmem:[%s3064_s26 + $0x58] sm:$0xff] %v2426_v33   ;;  %v1551_v41 = vadd.f32 %v3049_v17, %v1480_v35  ;;  %v1583_v42 = vadd.f32 %v3049_v17, %v1512_v36  ;;  %v1481_v43 = vmul.f32 %v3044_v15, %v1098_v39  ;;  %v1513_v44 = vmul.f32 %v3044_v15, %v1226_v40  ;;  %v1100_v45 = vpop.f32.mrb[51].mxu0  ;;  %v1228_v46 = vpop.f32.mrb[51].mxu1 }
 0x16e   : > { %2554 = vst [vmem:[%s3064_s26 + $0xd8] sm:$0xff] %v2506_v34  }
 0x16f   : > { %v1552_v47 = vadd.f32 %v3049_v17, %v1481_v43  ;;  %v1584_v48 = vadd.f32 %v3049_v17, %v1513_v44  ;;  %v1615_v49 = vmax.f32 %v1551_v41, 0.0  ;;  %v1647_v50 = vmax.f32 %v1583_v42, 0.0 }
 0x171   : > { %v1616_v51 = vmax.f32 %v1552_v47, 0.0  ;;  %v1648_v52 = vmax.f32 %v1584_v48, 0.0 }
 0x172   : > { %v1103_v53 = vpop.f32.mrb[52].mxu0  ;;  %v1231_v54 = vpop.f32.mrb[52].mxu1 }
 0x173   : > { %v2431_v55 = vpack.c.bf16 %v1616_v51, %v1615_v49  ;;  %v2511_v56 = vpack.c.bf16 %v1648_v52, %v1647_v50  ;;  %v1482_v57 = vmul.f32 %v3044_v15, %v1103_v53  ;;  %v1514_v58 = vmul.f32 %v3044_v15, %v1231_v54  ;;  %v1105_v59 = vpop.f32.mrb[53].mxu0  ;;  %v1233_v60 = vpop.f32.mrb[53].mxu1 }
 0x174   : > { %v1106_v61 = vpop.f32.mrb[54].mxu0  ;;  %v1234_v62 = vpop.f32.mrb[54].mxu1 }
 0x175   : > { %2539 = vst [vmem:[%s3064_s26 + $0x60] sm:$0xff] %v2431_v55   ;;  %2555 = vst [vmem:[%s3064_s26 + $0xe0] sm:$0xff] %v2511_v56   ;;  %v1553_v63 = vadd.f32 %v3049_v17, %v1482_v57  ;;  %v1585_v0 = vadd.f32 %v3049_v17, %v1514_v58  ;;  %v1483_v1 = vmul.f32 %v3044_v15, %v1106_v61  ;;  %v1108_v3 = vpop.f32.mrb[55].mxu0  ;;  %v1236_v4 = vpop.f32.mrb[55].mxu1 }
 0x176   : > { %v1515_v2 = vmul.f32 %v3044_v15, %v1234_v62 }
 0x177   : > { %v1554_v5 = vadd.f32 %v3049_v17, %v1483_v1  ;;  %v1617_v7 = vmax.f32 %v1553_v63, 0.0  ;;  %v1649_v8 = vmax.f32 %v1585_v0, 0.0 }
 0x178   : > { %v1586_v6 = vadd.f32 %v3049_v17, %v1515_v2 }
 0x179   : > { %v1618_v9 = vmax.f32 %v1554_v5, 0.0 }
 0x17a   : > { %v1650_v10 = vmax.f32 %v1586_v6, 0.0  ;;  %v1111_v11 = vpop.f32.mrb[56].mxu0  ;;  %v1239_v12 = vpop.f32.mrb[56].mxu1 }
 0x17b   : > { %v2436_v13 = vpack.c.bf16 %v1618_v9, %v1617_v7  ;;  %v1484_v16 = vmul.f32 %v3044_v15, %v1111_v11  ;;  %v1516_v18 = vmul.f32 %v3044_v15, %v1239_v12  ;;  %v1113_v19 = vpop.f32.mrb[57].mxu0  ;;  %v1241_v20 = vpop.f32.mrb[57].mxu1 }
 0x17c   : > { %v2516_v14 = vpack.c.bf16 %v1650_v10, %v1649_v8  ;;  %v1114_v21 = vpop.f32.mrb[58].mxu0  ;;  %v1242_v22 = vpop.f32.mrb[58].mxu1 }
 0x17d   : > { %2540 = vst [vmem:[%s3064_s26 + $0x68] sm:$0xff] %v2436_v13   ;;  %v1555_v23 = vadd.f32 %v3049_v17, %v1484_v16  ;;  %v1587_v24 = vadd.f32 %v3049_v17, %v1516_v18  ;;  %v1485_v25 = vmul.f32 %v3044_v15, %v1114_v21  ;;  %v1517_v26 = vmul.f32 %v3044_v15, %v1242_v22  ;;  %v1116_v27 = vpop.f32.mrb[59].mxu0  ;;  %v1244_v28 = vpop.f32.mrb[59].mxu1 }
 0x17e   : > { %2556 = vst [vmem:[%s3064_s26 + $0xe8] sm:$0xff] %v2516_v14  }
 0x17f   : > { %v1556_v29 = vadd.f32 %v3049_v17, %v1485_v25  ;;  %v1588_v30 = vadd.f32 %v3049_v17, %v1517_v26  ;;  %v1619_v31 = vmax.f32 %v1555_v23, 0.0  ;;  %v1651_v32 = vmax.f32 %v1587_v24, 0.0 }
 0x181   : > { %v1620_v33 = vmax.f32 %v1556_v29, 0.0  ;;  %v1652_v34 = vmax.f32 %v1588_v30, 0.0 }
 0x182   : > { %v1119_v35 = vpop.f32.mrb[60].mxu0  ;;  %v1247_v36 = vpop.f32.mrb[60].mxu1 }
 0x183   : > { %v2441_v37 = vpack.c.bf16 %v1620_v33, %v1619_v31  ;;  %v2521_v38 = vpack.c.bf16 %v1652_v34, %v1651_v32  ;;  %v1486_v39 = vmul.f32 %v3044_v15, %v1119_v35  ;;  %v1518_v40 = vmul.f32 %v3044_v15, %v1247_v36  ;;  %v1121_v41 = vpop.f32.mrb[61].mxu0  ;;  %v1249_v42 = vpop.f32.mrb[61].mxu1 }
 0x184   : > { %v1122_v43 = vpop.f32.mrb[62].mxu0  ;;  %v1250_v44 = vpop.f32.mrb[62].mxu1 }
 0x185   : > { %2541 = vst [vmem:[%s3064_s26 + $0x70] sm:$0xff] %v2441_v37   ;;  %2557 = vst [vmem:[%s3064_s26 + $0xf0] sm:$0xff] %v2521_v38   ;;  %v1557_v45 = vadd.f32 %v3049_v17, %v1486_v39  ;;  %v1589_v46 = vadd.f32 %v3049_v17, %v1518_v40  ;;  %v1487_v47 = vmul.f32 %v3044_v15, %v1122_v43  ;;  %v1124_v49 = vpop.f32.mrb[63].mxu0  ;;  %v1252_v50 = vpop.f32.mrb[63].mxu1 }
 0x186   : > { %v1519_v48 = vmul.f32 %v3044_v15, %v1250_v44 }
 0x187   : > { %v1558_v51 = vadd.f32 %v3049_v17, %v1487_v47  ;;  %v1621_v53 = vmax.f32 %v1557_v45, 0.0  ;;  %v1653_v54 = vmax.f32 %v1589_v46, 0.0 }
 0x188   : > { %v1590_v52 = vadd.f32 %v3049_v17, %v1519_v48 }
 0x189   : > { %v1622_v55 = vmax.f32 %v1558_v51, 0.0 }
 0x18a   : > { %v1654_v56 = vmax.f32 %v1590_v52, 0.0 }
 0x18b   : > { %v2446_v15 = vpack.c.bf16 %v1622_v55, %v1621_v53 }
 0x18c   : > { %v2526_v57 = vpack.c.bf16 %v1654_v56, %v1653_v54 }
 0x18d   : > { %2542 = vst [vmem:[%s3064_s26 + $0x78] sm:$0xff] %v2446_v15  }
 0x18e   : > { %2558 = vst [vmem:[%s3064_s26 + $0xf8] sm:$0xff] %v2526_v57  }
 0x18f   : > { %2757 = shalt.err (!%p2754_p5)
}
 0x190   : > { %s2758_s12 = scalar_lea.hbm %s3219_s7, 4096  ;;  %s2762_s22 = scalar_lea.hbm %s3277_s4, 16384 }
 0x191   : > { %p2759_p6 = scmp.ne.s32.totalorder %s3219_s7, %s2758_s12  ;;  %p2763_p10 = scmp.lt.u32.totalorder %s3219_s7, %s3277_s4 }
 0x192   : > { %p2764_p11 = scmp.lt.u32.totalorder %s2762_s22, %s2758_s12  ;;  %p2766_p13 = scmp.lt.u32.totalorder %s2758_s12, %s3219_s7 }
 0x193   : > { %p2760_p7 = pnand %p2759_p6, %p2894_p4 }
 0x194   : > { %p2765_p12 = por %p2764_p11, %p2763_p10 }
 0x195   : > { %p2761_p9 = pneg %p2760_p7 }
 0x196   : > { %p2767_p0 = por %p2766_p13, %p2765_p12 }
 0x198   : > { %p2768_p1 = pnand %p2767_p0, %p2761_p9 }
 0x19a   : > { %2771 = shalt.err (!%p2768_p1)
}
 0x19b   : > { %s2827_s26 = smov 64   ;;  %s2828_s29 = smov 4  }
 0x19c   : > { %2579 = dma.vmem_to_hbm [thread:$0]  (%p2894_p4), %s3221_s30, 4096, %s3219_s7, %s3227_s18, %s2827_s26, %s2827_s26, %s2828_s29  }
 0x19d PF: > { %p2585_p2 = scmp.ge.s32.totalorder %s2822_s20, 2  ;;  %s2005_s5 = sand.u32 1, %s2802_s15  }
 0x19e   : > { %s2006_s6 = scalar_lea.sflag [#allocation4], %s2005_s5 }
 0x19f   : > { %p2582_p3 = pnand %p2585_p2, %p2901_p8 }
 0x1a1   : > { %2797 = dma.done.wait (!%p2582_p3), %s2006_s6, 4096  }
 0x1a2   : > { %2799 = vsyncadd (!%p2582_p3), %s2006_s6, 4294963200  ;;  %s17_s20 = sadd.s32 1, %s2822_s20   ;;  %s3280_s15 = smov %s2806_s16 }
 0x1a3   : > { %p14_p5 = scmp.ge.s32.totalorder %s17_s20, 6   ;;  %s3281_s16 = smov %s2810_s17 }
 0x1a4   : > { %s3282_s17 = smov %s2907_s28  ;;  %s3283_s18 = smov %s2818_s19 }
 0x1a5   : > { %s3284_s19 = smov %s3286_s23  ;;  %16 = sbr.rel (!%p14_p5) target bundleno = 4 (0x4), region = 88 }
 0x1ac   :  { %2011 = vsyncpa [#allocation4], 1 }
 0x1ad   :  { %2013 = vsyncpa [#allocation4 + $0x1], 1 }

</bundles_post_ra>
